<compile_context>
chip_gen: v6e
topology: v6e:2x2x1
jax: 0.10.0
libtpu: 0.0.40
codegen_flags: <defaults>
</compile_context>

<pallas_src>
import re
from functools import partial

import jax
import jax.numpy as jnp
from jax.experimental import pallas as pl
from jax.experimental.pallas import tpu as pltpu


# ---------------------------------------------------------------- tiling ----
_LANE = 128
_MIN_PALLAS_BYTES = 2 << 20        # below this, plain jnp (XLA fusion) wins


def _tpu_generation(default=6):
    try:
        kind = jax.devices()[0].device_kind
    except Exception:
        return default
    m = re.search(r"(\d+)", kind)
    return int(m.group(1)) if m else default


_GEN = _tpu_generation()
if _GEN >= 7:                       # v7x: 3.2 TB/s HBM, 64 MiB physical VMEM
    _TARGET_TILE_BYTES = 4 << 20
    _VMEM_LIMIT_BYTES = 48 << 20
elif _GEN == 6:                     # v6e: 128 MiB physical VMEM
    _TARGET_TILE_BYTES = 3 << 20
    _VMEM_LIMIT_BYTES = 64 << 20
else:                               # v5e and older / unknown: stay conservative
    _TARGET_TILE_BYTES = 3 << 19    # 1.5 MiB
    _VMEM_LIMIT_BYTES = 32 << 20


def _sublane_multiple(dtype):
    """Native sublane packing: 8 rows (f32), 16 (bf16/f16), 32 (int8/fp8)."""
    return max(8, 32 // max(jnp.dtype(dtype).itemsize, 1))


def _pick_tile_rows(n_rows, row_bytes, dtype):
    """Row-tile size: ~tile-budget bytes, >=4 grid steps when big enough,
    rounded to the dtype's sublane multiple (or full extent)."""
    sub = _sublane_multiple(dtype)
    if n_rows <= sub:
        return n_rows
    tm = max(1, _TARGET_TILE_BYTES // max(int(row_bytes), 1))
    if n_rows >= 4 * sub:
        # guarantee >=4 grid steps: 2 per TensorCore on v7x's megacore, and
        # enough steps for the double-buffered pipeline to overlap.
        tm = min(tm, n_rows // 4)
    tm = max(sub, min(tm, n_rows))
    return (tm // sub) * sub


def _lane_dense_view(x):
    """2-D view for elementwise ops whose last dim is a multiple of 128."""
    total = x.size
    for n in (512, 1024, 2048, 4096, 256, 128):
        if total % n == 0:
            return x.reshape(total // n, n)
    # TODO(synk): pad to a lane multiple instead of this masked-store fallback.
    return x.reshape(-1, x.shape[-1])


def _row_tiled_call(kernel, x2d, *, out_cols=None, out_dtype=None,
                    extra_inputs=(), extra_specs=()):
    """Run `kernel` over row tiles of x2d (auto double-buffered pipeline)."""
    M, N = x2d.shape
    out_cols = N if out_cols is None else out_cols
    out_dtype = x2d.dtype if out_dtype is None else out_dtype
    tm = _pick_tile_rows(M, N * x2d.dtype.itemsize, x2d.dtype)
    return pl.pallas_call(
        kernel,
        out_shape=jax.ShapeDtypeStruct((M, out_cols), out_dtype),
        grid=(pl.cdiv(M, tm),),
        in_specs=[pl.BlockSpec((tm, N), lambda i: (i, 0))] + list(extra_specs),
        out_specs=pl.BlockSpec((tm, out_cols), lambda i: (i, 0)),
        compiler_params=pltpu.CompilerParams(
            dimension_semantics=("parallel",),      # shard tiles on v7x's 2 TCs
            vmem_limit_bytes=_VMEM_LIMIT_BYTES),
    )(x2d, *extra_inputs)


# --------------------------------------------------------------- kernels ----
def _unary_kernel(fn, x_ref, o_ref):
    """Elementwise op on the tile."""
    o_ref[...] = fn(x_ref[...]).astype(o_ref.dtype)


def _scalar_kernel(fn, x_ref, s_ref, o_ref):
    """Elementwise op with a scalar operand read from SMEM (compute dtype)."""
    s = s_ref[0]
    o_ref[...] = fn(x_ref[...].astype(s.dtype), s).astype(o_ref.dtype)


def _softmax_lastdim_kernel(x_ref, o_ref):
    """Stable softmax over the last (lane) dimension; exact division."""
    x = x_ref[...].astype(jnp.float32)
    m = jnp.max(x, axis=-1, keepdims=True)
    e = jnp.exp(x - m)
    s = jnp.sum(e, axis=-1, keepdims=True)
    o_ref[...] = (e / s).astype(o_ref.dtype)


def _softmax_packed_kernel(w, x_ref, o_ref):
    """Softmax over contiguous, aligned W-segments of a lane-dense (tm, 128)
    packed view (128 // w logical rows per packed row)."""
    x = x_ref[...].astype(jnp.float32)                 # (tm, 128)
    # Stabilize with the packed-row max (>= every segment max); the shift
    # cancels exactly inside each segment's normalization.
    # TODO(synk): use a true per-segment max to also guard the (pathological)
    # case where one segment sits > ~87 below the packed-row max in f32.
    m = jnp.max(x, axis=-1, keepdims=True)
    e = jnp.exp(x - m)
    r = jax.lax.broadcasted_iota(jnp.int32, (_LANE, _LANE), 0)
    c = jax.lax.broadcasted_iota(jnp.int32, (_LANE, _LANE), 1)
    seg = jnp.where(r // w == c // w, 1.0, 0.0)        # same-segment mask
    # Segmented sum, already broadcast across each segment (MXU, bf16x3).
    s = jnp.dot(e, seg, preferred_element_type=jnp.float32,
                precision=jax.lax.Precision.HIGH)
    o_ref[...] = (e / s).astype(o_ref.dtype)


def _mean_grouped_kernel(w, x_ref, o_ref):
    """Segmented mean via a 0/1 selector matmul -> lane-dense (tm, 128) out.
    The selector is built in-kernel (no HBM read, no double-buffered VMEM)."""
    gw = x_ref.shape[-1]                               # 128 * w
    r = jax.lax.broadcasted_iota(jnp.int32, (gw, _LANE), 0)
    c = jax.lax.broadcasted_iota(jnp.int32, (gw, _LANE), 1)
    sel = jnp.where(r // w == c, 1.0, 0.0)             # (128*w, 128) selector
    acc = jnp.dot(x_ref[...].astype(jnp.float32), sel,
                  preferred_element_type=jnp.float32,
                  precision=jax.lax.Precision.HIGH)    # not HIGHEST (v5e MXU)
    o_ref[...] = (acc * (1.0 / w)).astype(o_ref.dtype)


def _mean_lastdim_kernel(inv_w, x_ref, o_ref):
    """Fallback: mean over the last (lane) dimension -> (tm, 1) output."""
    x = x_ref[...].astype(jnp.float32)
    o_ref[...] = (jnp.sum(x, axis=-1, keepdims=True) * inv_w).astype(o_ref.dtype)


# -------------------------------------------------------------- dispatch ----
_ELEMENTWISE_UNARY = {
    "sigmoid": jax.nn.sigmoid,
    "tanh":    jnp.tanh,
    "relu":    lambda v: jnp.maximum(v, 0),
    "exp":     jnp.exp,
    "log":     jnp.log,
    "sqrt":    jnp.sqrt,
    "abs":     jnp.abs,
    "neg":     lambda v: -v,
    "square":  lambda v: v * v,
}

_ELEMENTWISE_SCALAR = {
    "mul": lambda v, s: v * s,
    "add": lambda v, s: v + s,
    "sub": lambda v, s: v - s,
    "div": lambda v, s: v / s,
}


def _scalar_dtypes(name, x_dtype, scalar):
    """torch-like type promotion for tensor (op) python-scalar."""
    x_is_float = jnp.issubdtype(x_dtype, jnp.floating)
    if name == "div":
        out_dtype = jnp.dtype(x_dtype) if x_is_float else jnp.dtype(jnp.float32)
    elif (not x_is_float) and isinstance(scalar, float):
        out_dtype = jnp.dtype(jnp.float32)   # int tensor (op) py-float -> f32
    else:
        out_dtype = jnp.dtype(x_dtype)
    compute_dtype = (jnp.dtype(jnp.float32)
                     if jnp.issubdtype(out_dtype, jnp.floating)
                     else jnp.dtype(jnp.int32))
    return out_dtype, compute_dtype


def _pow_fn(x_dtype, scalar):
    """pow uses the static exponent directly (integer_pow / lax.pow)."""
    if (not jnp.issubdtype(x_dtype, jnp.floating)) and isinstance(scalar, float):
        return (lambda v: v.astype(jnp.float32) ** scalar), jnp.dtype(jnp.float32)
    return (lambda v: v ** scalar), jnp.dtype(x_dtype)


class DynamicPassivePallas:
    """JAX/Pallas equivalent of DynamicPassive_nnModule.

    forward(x) == eval(f"x.{fn_name}(*/**fn_params)") in PyTorch, with the
    supported tensor methods routed through Pallas TPU kernels.
    """

    def __init__(self, fn_name, fn_params=None, *, force_pallas=False):
        fn_params = dict() if fn_params is None else fn_params
        self.fn_name = fn_name
        self.force_pallas = force_pallas
        if isinstance(fn_params, dict):
            self.args, self.kwargs = (), dict(fn_params)
        elif isinstance(fn_params, (list, tuple)):
            self.args, self.kwargs = tuple(fn_params), {}
        else:
            raise AssertionError(
                f"`type(fn_params)={type(fn_params)}` must be dict/list/tuple")

    # ------------------------------------------------------------------ #
    def _scalar_arg(self):
        return self.args[0] if self.args else self.kwargs["other"]

    def _softmax_dim(self, x):
        if "dim" in self.kwargs:
            return self.kwargs["dim"]
        return self.args[0] if self.args else -1

    def _mean_args(self):
        dim = self.kwargs.get("dim", self.args[0] if len(self.args) >= 1 else None)
        keepdim = self.kwargs.get(
            "keepdim", self.args[1] if len(self.args) >= 2 else False)
        return dim, keepdim

    # ---------------------------------------------------------- jnp path --
    def _apply_jnp(self, x):
        name = self.fn_name
        if name in _ELEMENTWISE_UNARY:
            return _ELEMENTWISE_UNARY[name](x).astype(x.dtype)
        if name == "pow":
            fn, out_dtype = _pow_fn(x.dtype, self._scalar_arg())
            return fn(x).astype(out_dtype)
        if name in _ELEMENTWISE_SCALAR:
            scalar = self._scalar_arg()
            out_dtype, compute_dtype = _scalar_dtypes(name, x.dtype, scalar)
            s = jnp.asarray(scalar, compute_dtype)
            return _ELEMENTWISE_SCALAR[name](
                x.astype(compute_dtype), s).astype(out_dtype)
        if name == "softmax":
            dim = self._softmax_dim(x)
            return jax.nn.softmax(x.astype(jnp.float32), axis=dim).astype(x.dtype)
        if name == "mean":
            dim, keepdim = self._mean_args()
            xf = x.astype(jnp.float32)
            if dim is None:
                return jnp.mean(xf).astype(x.dtype)
            return jnp.mean(xf, axis=dim, keepdims=keepdim).astype(x.dtype)
        raise NotImplementedError(
            f"fn_name={name!r} has no dispatch entry")

    # ------------------------------------------------------------------ #
    def __call__(self, x):
        x = jnp.asarray(x)
        name = self.fn_name

        # Tiny tensors: the pallas_call boundary + fixed ~0.35us/step overhead
        # dominate and block XLA fusion with neighbors -> plain jnp wins.
        if x.ndim == 0 or (not self.force_pallas
                           and x.size * x.dtype.itemsize < _MIN_PALLAS_BYTES):
            return self._apply_jnp(x)

        # -------- elementwise unary --------------------------------------
        if name in _ELEMENTWISE_UNARY:
            x2d = _lane_dense_view(x)
            out = _row_tiled_call(
                partial(_unary_kernel, _ELEMENTWISE_UNARY[name]), x2d)
            return out.reshape(x.shape)

        # -------- pow (static exponent, closure path) ---------------------
        if name == "pow":
            fn, out_dtype = _pow_fn(x.dtype, self._scalar_arg())
            x2d = _lane_dense_view(x)
            out = _row_tiled_call(partial(_unary_kernel, fn), x2d,
                                  out_dtype=out_dtype)
            return out.reshape(x.shape)

        # -------- elementwise with scalar operand (via SMEM) -------------
        if name in _ELEMENTWISE_SCALAR:
            scalar = self._scalar_arg()
            out_dtype, compute_dtype = _scalar_dtypes(name, x.dtype, scalar)
            s_arr = jnp.asarray([scalar], dtype=compute_dtype)
            x2d = _lane_dense_view(x)
            out = _row_tiled_call(
                partial(_scalar_kernel, _ELEMENTWISE_SCALAR[name]),
                x2d, out_dtype=out_dtype,
                extra_inputs=(s_arr,),
                extra_specs=(pl.BlockSpec(
                    memory_space=pltpu.MemorySpace.SMEM),))
            return out.reshape(x.shape)

        # -------- softmax over last dim -----------------------------------
        if name == "softmax":
            dim = self._softmax_dim(x)
            if dim not in (-1, x.ndim - 1):
                # TODO(synk): add a Pallas path for non-last-dim softmax.
                return self._apply_jnp(x)
            W = x.shape[-1]
            M = x.size // W
            if W < _LANE and _LANE % W == 0 and (M * W) % _LANE == 0:
                # Lane-dense packing: 128/W logical rows per kernel row,
                # segmented normalization done in-kernel (full-width stores).
                xp = x.reshape((M * W) // _LANE, _LANE)
                out = _row_tiled_call(partial(_softmax_packed_kernel, W), xp)
                return out.reshape(x.shape)
            x2d = x.reshape(M, W)
            out = _row_tiled_call(_softmax_lastdim_kernel, x2d)
            return out.reshape(x.shape)

        # -------- mean over last dim ---------------------------------------
        if name == "mean":
            dim, keepdim = self._mean_args()
            if dim is None or dim not in (-1, x.ndim - 1):
                # TODO(synk): Pallas path only covers last-dim mean.
                return self._apply_jnp(x)
            W = x.shape[-1]
            M = x.size // W
            out_shape = x.shape[:-1] + ((1,) if keepdim else ())

            if W <= 32 and M % _LANE == 0:
                # Group 128 logical rows per kernel row; reduce each W-segment
                # with an in-kernel 0/1 selector matmul -> lane-dense (.,128)
                # slab written with unmasked full-width stores.
                xg = x.reshape(M // _LANE, _LANE * W)
                out = _row_tiled_call(partial(_mean_grouped_kernel, W), xg,
                                      out_cols=_LANE, out_dtype=x.dtype)
                return out.reshape(out_shape)

            # Fallback: reduce over lanes, (M, 1) output.
            x2d = x.reshape(M, W)
            out = _row_tiled_call(partial(_mean_lastdim_kernel, 1.0 / W),
                                  x2d, out_cols=1, out_dtype=x.dtype)
            return out.reshape(out_shape)

        raise NotImplementedError(
            f"fn_name={name!r} has no Pallas dispatch entry")


# ---------------------------------------------------------------- demo ------
if __name__ == "__main__":
    key = jax.random.PRNGKey(0)
    k1, k2 = jax.random.split(key)
    # NCHW input, like a PyTorch feature map: (batch=2, channels=4, 16, 16)
    x = jax.random.normal(k1, (2, 4, 16, 16), dtype=jnp.float32)

    # force_pallas=True so the small demo tensor still exercises the kernels
    y_sig = DynamicPassivePallas("sigmoid", force_pallas=True)(x)
    y_sm = DynamicPassivePallas("softmax", {"dim": -1}, force_pallas=True)(x)
    y_mul = DynamicPassivePallas("mul", [2.0], force_pallas=True)(x)
    y_mean = DynamicPassivePallas(
        "mean", {"dim": -1, "keepdim": True}, force_pallas=True)(x)
    y_pow = DynamicPassivePallas("pow", [2], force_pallas=True)(x)

    # medium tensor (4 MiB): default size-based dispatch picks Pallas and the
    # row grid gets >= 4 steps (2 per TensorCore on v7x)
    xb = jax.random.normal(k2, (1024, 1024), dtype=jnp.float32)
    y_big = DynamicPassivePallas("mul", [3.0])(xb)

    # tiny tensor with the default threshold -> fused jnp fallback path
    y_small = DynamicPassivePallas("add", [1.0])(x)

    for y in (y_sig, y_sm, y_mul, y_mean, y_pow, y_big, y_small):
        jax.block_until_ready(y)

    # reference checks (plain JAX) to make sure kernel semantics match torch
    assert jnp.allclose(y_sig, jax.nn.sigmoid(x), atol=1e-6)
    assert jnp.allclose(y_sm, jax.nn.softmax(x, axis=-1), atol=1e-5, rtol=1e-5)
    assert jnp.allclose(y_mul, x * 2.0)
    assert jnp.allclose(y_mean, jnp.mean(x, axis=-1, keepdims=True),
                        atol=1e-5, rtol=1e-5)
    assert jnp.allclose(y_pow, x * x, atol=1e-6)
    assert jnp.allclose(y_big, xb * 3.0)
    assert jnp.allclose(y_small, x + 1.0)
    assert y_sig.shape == x.shape and y_sm.shape == x.shape
    assert y_mul.shape == x.shape and y_pow.shape == x.shape
    assert y_mean.shape == (2, 4, 16, 1)
    assert y_big.shape == xb.shape

    print("KERNEL_OK")
</pallas_src>

<mosaic_0001>
module attributes {stable_mosaic.version = 11 : i64} {
  func.func @_unary_kernel(%arg0: i32, %arg1: memref<4x512xf32, #tpu.memory_space<vmem>>, %arg2: memref<4x512xf32, #tpu.memory_space<vmem>>) attributes {dimension_semantics = [#tpu.dimension_semantics<parallel>], iteration_bounds = array<i64: 1>, scalar_prefetch = 0 : i64, scratch_operands = 0 : i64, tpu.core_type = #tpu.core_type<tc>, window_params = [{transform_indices = @transform_0, window_bounds = array<i64: 4, 512>}, {transform_indices = @transform_1, window_bounds = array<i64: 4, 512>}]} {
    %c0 = arith.constant 0 : index
    %c0_0 = arith.constant 0 : index
    %0 = vector.load %arg1[%c0, %c0_0] : memref<4x512xf32, #tpu.memory_space<vmem>>, vector<4x512xf32>
    %1 = arith.negf %0 : vector<4x512xf32>
    %2 = math.exp %1 : vector<4x512xf32>
    %cst = arith.constant 1.000000e+00 : f32
    %3 = vector.broadcast %cst : f32 to vector<4x512xf32>
    %4 = arith.addf %3, %2 : vector<4x512xf32>
    %5 = arith.divf %3, %4 : vector<4x512xf32>
    %c0_1 = arith.constant 0 : index
    %c0_2 = arith.constant 0 : index
    %6 = vector.load %arg2[%c0_1, %c0_2] : memref<4x512xf32, #tpu.memory_space<vmem>>, vector<4x512xf32>
    tpu.vector_store %arg2[%c0_1, %c0_2], %5 {strides = array<i32>} : memref<4x512xf32, #tpu.memory_space<vmem>>, vector<4x512xf32>,
    return
  }
  func.func @transform_0(%arg0: i32) -> (i32, i32) {
    %c0_i32 = arith.constant 0 : i32
    %c0_i32_0 = arith.constant 0 : i32
    return %arg0, %c0_i32 : i32, i32
  }
  func.func @transform_1(%arg0: i32) -> (i32, i32) {
    %c0_i32 = arith.constant 0 : i32
    %c0_i32_0 = arith.constant 0 : i32
    return %arg0, %c0_i32 : i32, i32
  }
}

</mosaic_0001>

<bundles_post_ra>
// kernel: tpu_custom_call.1
= control target key start
LH: loop header
LB: loop body
LE: loop exit
PB: predicated region body
PF: predicated region fallthrough
CT: control target
= control target key end

     0   :  { %6 = vsyncpa [#allocation3], 0  ;;  %s126_s0 = inlined_call_operand.hbm [shape: f32[4,512], index: 0, kind: input, shape index: {}]   ;;  %s127_s1 = inlined_call_operand.hbm [shape: f32[4,512], index: 1, kind: output, shape index: {}]  }
   0x1   :  { %7 = vsyncpa [#allocation4], 0  ;;  %s108_s6 = smov [#allocation2]  }
   0x2   :  { %s14_s7 = sshll.u32 %s108_s6, 4  ;;  %s15_s7 = int_to_ptr.vmem [resolvable:$true] %s14_s7 }
   0x3   :  { %s72_s8 = scalar_lea.vmem %s15_s7, 256  ;;  %p77_p1 = scmp.lt.s32.totalorder %s15_s7, %s15_s7 }
   0x4   :  { %p73_p0 = scmp.ne.s32.totalorder %s15_s7, %s72_s8  ;;  %p78_p2 = scmp.lt.s32.totalorder %s72_s8, %s72_s8 }
   0x6   :  { %p79_p3 = por %p78_p2, %p77_p1 }
   0x8   :  { %p80_p4 = pnand %p79_p3, %p73_p0 }
   0xa   :  { %83 = shalt.err (!%p80_p4)
}
   0xb   :  { %17 = dma.hbm_to_vmem [thread:$0]  %s126_s0, 256, %s15_s7, [#allocation3]  }
   0xc   :  { %104 = dma.done.wait [#allocation3], 256  }
   0xd   :  { %105 = vsyncadd [#allocation3], 4294967040  ;;  %v21_v0 = vld [vmem:[#allocation2] sm:$0xff]  ;;  %v22_v1 = vld [vmem:[#allocation2 + $0x8] sm:$0xff]  ;;  %s109_s11 = smov [#allocation5]  }
   0xe   :  { %v52_v2 = vmul.f32 -1.442695, %v21_v0  ;;  %v53_v3 = vmul.f32 -1.442695, %v22_v1  ;;  %s43_s12 = sshll.u32 %s109_s11, 4  ;;  %s44_s12 = int_to_ptr.vmem [resolvable:$true] %s43_s12 }
   0xf   :  { %s84_s0 = scalar_lea.vmem %s44_s12, 256  ;;  %p89_p6 = scmp.lt.s32.totalorder %s44_s12, %s44_s12 }
  0x10   :  { %56 = vpow2.f32 %v52_v2  ;;  %p85_p5 = scmp.ne.s32.totalorder %s44_s12, %s84_s0  ;;  %p90_p7 = scmp.lt.s32.totalorder %s84_s0, %s84_s0 }
  0x11   :  { %58 = vpow2.f32 %v53_v3 }
  0x12   :  { %p91_p8 = por %p90_p7, %p89_p6 }
  0x14   :  { %p92_p9 = pnand %p91_p8, %p85_p5 }
  0x1d   :  { %v57_v4 = vpop.eup %56 }
  0x1e   :  { %v59_v5 = vpop.eup %58  ;;  %v29_v6 = vadd.f32 1.0, %v57_v4 }
  0x1f   :  { %v30_v7 = vadd.f32 1.0, %v59_v5 }
  0x20   :  { %60 = vrcp.f32 %v29_v6 }
  0x21   :  { %62 = vrcp.f32 %v30_v7 }
  0x2d   :  { %v61_v8 = vpop.eup %60 }
  0x2e   :  { %v63_v9 = vpop.eup %62  ;;  %35 = vst [vmem:[#allocation5] sm:$0xff] %v61_v8 }
  0x2f   :  { %36 = vst [vmem:[#allocation5 + $0x8] sm:$0xff] %v63_v9 }
  0x30   :  { %95 = shalt.err (!%p92_p9)
}
  0x31   :  { %46 = dma.vmem_to_hbm [thread:$0]  %s44_s12, 256, %s127_s1, [#allocation4]  }
  0x32   :  { %106 = dma.done.wait [#allocation4], 256  }
  0x33   :  { %107 = vsyncadd [#allocation4], 4294967040 }
  0x34   :  { %50 = vsyncpa [#allocation3], 1 }
  0x35   :  { %51 = vsyncpa [#allocation4], 1 }

</bundles_post_ra>
